<compile_context>
chip_gen: v6e
topology: v6e:2x2x1
jax: 0.10.0
libtpu: 0.0.40
codegen_flags: <defaults>
</compile_context>

<pallas_src>
import functools

import jax
import jax.numpy as jnp
from jax.experimental import pallas as pl
from jax.experimental.pallas import tpu as pltpu


def _round_up(x, m):
    return (x + m - 1) // m * m


# ----------------------------------------------------------------------------
# Pallas kernel: fused  out = relu?(x @ w + b)
#   grid = (M_tiles [parallel], K_tiles [arbitrary, reduction])
#   f32 VMEM accumulator, bias + ReLU applied only on the last K step.
# ----------------------------------------------------------------------------
def _matmul_bias_kernel(x_ref, w_ref, b_ref, o_ref, acc_ref, *, relu):
    k = pl.program_id(1)

    @pl.when(k == 0)
    def _():
        acc_ref[...] = jnp.zeros_like(acc_ref)

    acc_ref[...] += jnp.dot(
        x_ref[...], w_ref[...], preferred_element_type=jnp.float32
    )

    @pl.when(k == pl.num_programs(1) - 1)
    def _():
        out = acc_ref[...] + b_ref[...]          # bias (1, N) broadcasts over rows
        if relu:
            out = jnp.maximum(out, 0.0)
        o_ref[...] = out.astype(o_ref.dtype)


def pallas_matmul_bias(x, w, b, *, relu=False, tile_m=512, tile_k=512):
    """out = relu?(x @ w + b).  x: (M, K) f32, w: (K, N) f32, b: (N,) f32."""
    M, K = x.shape
    N = w.shape[1]

    # Lane-densify the output channel dim (unmasked stores) and make the row /
    # reduction axes tile evenly.  Zero padding does not change the result.
    n_pad = _round_up(N, 128)
    tm = tile_m if M >= tile_m else _round_up(M, 16)
    m_pad = _round_up(M, tm)
    tk = K if K <= tile_k else tile_k
    k_pad = _round_up(K, tk)

    xp = x if (m_pad == M and k_pad == K) else jnp.pad(
        x, ((0, m_pad - M), (0, k_pad - K)))
    wp = w if (k_pad == K and n_pad == N) else jnp.pad(
        w, ((0, k_pad - K), (0, n_pad - N)))
    bp = b if n_pad == N else jnp.pad(b, ((0, n_pad - N),))

    # bf16 MXU inputs, f32 accumulation.
    xp = xp.astype(jnp.bfloat16)
    wp = wp.astype(jnp.bfloat16)
    bp = bp.reshape(1, n_pad).astype(jnp.float32)

    grid = (m_pad // tm, k_pad // tk)
    kernel = functools.partial(_matmul_bias_kernel, relu=relu)
    out = pl.pallas_call(
        kernel,
        out_shape=jax.ShapeDtypeStruct((m_pad, n_pad), jnp.float32),
        grid=grid,
        in_specs=[
            pl.BlockSpec((tm, tk), lambda i, k: (i, k)),
            pl.BlockSpec((tk, n_pad), lambda i, k: (k, 0)),
            pl.BlockSpec((1, n_pad), lambda i, k: (0, 0)),
        ],
        out_specs=pl.BlockSpec((tm, n_pad), lambda i, k: (i, 0)),
        scratch_shapes=[pltpu.VMEM((tm, n_pad), jnp.float32)],
        compiler_params=pltpu.CompilerParams(
            dimension_semantics=("parallel", "arbitrary"),
            vmem_limit_bytes=48 * 1024 * 1024,
        ),
    )(xp, wp, bp)

    if m_pad != M or n_pad != N:
        out = out[:M, :N]
    return out


# ----------------------------------------------------------------------------
# Conv glue: im2col in plain JAX, matmul on the MXU via the Pallas kernel.
# ----------------------------------------------------------------------------
def _im2col(x_nhwc, ksize, stride, pad):
    N, H, W, C = x_nhwc.shape
    xp = jnp.pad(x_nhwc, ((0, 0), (pad, pad), (pad, pad), (0, 0)))
    Ho = (H + 2 * pad - ksize) // stride + 1
    Wo = (W + 2 * pad - ksize) // stride + 1
    patches = []
    for dh in range(ksize):
        for dw in range(ksize):
            patches.append(
                xp[:, dh:dh + stride * Ho:stride, dw:dw + stride * Wo:stride, :]
            )
    cols = jnp.concatenate(patches, axis=-1)  # (N, Ho, Wo, k*k*C)
    return cols.reshape(N * Ho * Wo, ksize * ksize * C), Ho, Wo


def conv2d(x_nhwc, w_flat, b, *, ksize, stride, pad, relu):
    """w_flat layout: (ksize*ksize*Cin, Cout) matching the im2col patch order."""
    N = x_nhwc.shape[0]
    cols, Ho, Wo = _im2col(x_nhwc, ksize, stride, pad)
    out = pallas_matmul_bias(cols, w_flat, b, relu=relu)
    return out.reshape(N, Ho, Wo, w_flat.shape[1])


# ----------------------------------------------------------------------------
# Parameter construction (deterministic): weight ~ N(0, 0.01), bias = 0,
# mirroring the module's init loop over Conv2d / Linear layers.
# ----------------------------------------------------------------------------
def make_params(key, c_output=21):
    dims_full = [512, 1024, 2048]          # dim_dict['resnet50']
    dims = [d // 64 for d in dims_full]    # scaled-down: [8, 16, 32]
    c2, c3, c4 = dims
    c_in = 3
    c_stem = c2

    def conv_w(k, kk, cin, cout):
        return 0.01 * jax.random.normal(k, (kk * kk * cin, cout), jnp.float32)

    ks = jax.random.split(key, 8)
    params = {
        # backbone
        "stem_w": conv_w(ks[0], 3, c_in, c_stem), "stem_b": jnp.zeros((c_stem,)),
        "l2_w": conv_w(ks[1], 3, c_stem, c2),     "l2_b": jnp.zeros((c2,)),
        "l3_w": conv_w(ks[2], 3, c2, c3),         "l3_b": jnp.zeros((c3,)),
        "l4_w": conv_w(ks[3], 3, c3, c4),         "l4_b": jnp.zeros((c4,)),
        # heads (synthesized; see TODO at top)
        "pred_w": conv_w(ks[4], 1, c4, c_output), "pred_b": jnp.zeros((c_output,)),
        "sal_w": conv_w(ks[5], 1, c4, 1),         "sal_b": jnp.zeros((1,)),
        "cls_w": 0.01 * jax.random.normal(ks[6], (c4, c_output), jnp.float32),
        "cls_b": jnp.zeros((c_output,)),
        "cls0_w": 0.01 * jax.random.normal(ks[7], (c3, c_output), jnp.float32),
        "cls0_b": jnp.zeros((c_output,)),
    }
    return params


# ----------------------------------------------------------------------------
# MTFCN forward
# ----------------------------------------------------------------------------
def mtfcn_forward(params, x_nchw):
    """x_nchw: (N, 3, H, W) float32 -> (pred, pred_sal, pred_cls, pred_cls0).

    pred      : (N, c_output, H/8, W/8)   per-pixel class logits (NCHW)
    pred_sal  : (N, 1, H/8, W/8)          per-pixel saliency logits (NCHW)
    pred_cls  : (N, c_output)             image-level logits from x32
    pred_cls0 : (N, c_output)             image-level logits from hooked layer3 feat
    """
    x = jnp.transpose(x_nchw, (0, 2, 3, 1))  # NCHW -> NHWC

    # backbone (hooks on layer2 / layer3 collect feats in execution order)
    h = conv2d(x, params["stem_w"], params["stem_b"], ksize=3, stride=2, pad=1, relu=True)
    f2 = conv2d(h, params["l2_w"], params["l2_b"], ksize=3, stride=2, pad=1, relu=True)
    f3 = conv2d(f2, params["l3_w"], params["l3_b"], ksize=3, stride=2, pad=1, relu=True)
    x32 = conv2d(f3, params["l4_w"], params["l4_b"], ksize=3, stride=1, pad=1, relu=True)
    feats = [f2, f3]  # as collected by the registered forward hooks

    # dense heads on x32: fuse the pred (c_output) + pred_sal (1) 1x1 convs into
    # a single lane-dense matmul (one Pallas launch), split afterwards.
    c_out = params["pred_w"].shape[1]
    head_w = jnp.concatenate([params["pred_w"], params["sal_w"]], axis=1)
    head_b = jnp.concatenate([params["pred_b"], params["sal_b"]], axis=0)
    head = conv2d(x32, head_w, head_b, ksize=1, stride=1, pad=0, relu=False)
    pred = head[..., :c_out]
    pred_sal = head[..., c_out:c_out + 1]

    # image-level heads: global-avg-pool + tiny linear classifiers.  These are
    # (2,32)x(32,21) matmuls -- kernel-launch overhead dwarfs the math, so keep
    # them as plain jnp.dot instead of separate pallas_call launches.
    pooled4 = jnp.mean(x32, axis=(1, 2))        # (N, c4)
    pooled3 = jnp.mean(feats[1], axis=(1, 2))   # (N, c3)
    pred_cls = pooled4 @ params["cls_w"] + params["cls_b"]
    pred_cls0 = pooled3 @ params["cls0_w"] + params["cls0_b"]

    # back to NCHW for the dense outputs (PyTorch convention)
    pred = jnp.transpose(pred, (0, 3, 1, 2))
    pred_sal = jnp.transpose(pred_sal, (0, 3, 1, 2))
    return pred, pred_sal, pred_cls, pred_cls0


# ----------------------------------------------------------------------------
if __name__ == "__main__":
    key = jax.random.PRNGKey(0)
    k_param, k_x = jax.random.split(key)

    c_output = 21
    params = make_params(k_param, c_output=c_output)

    # small input consistent with an RGB image fed to the resnet backbone
    x = jax.random.normal(k_x, (2, 3, 16, 16), jnp.float32)

    fwd = jax.jit(functools.partial(mtfcn_forward, params))
    pred, pred_sal, pred_cls, pred_cls0 = fwd(x)
    jax.block_until_ready((pred, pred_sal, pred_cls, pred_cls0))

    assert pred.shape == (2, c_output, 2, 2), pred.shape
    assert pred_sal.shape == (2, 1, 2, 2), pred_sal.shape
    assert pred_cls.shape == (2, c_output), pred_cls.shape
    assert pred_cls0.shape == (2, c_output), pred_cls0.shape
    assert bool(jnp.isfinite(pred).all() & jnp.isfinite(pred_cls).all())

    print("KERNEL_OK")
</pallas_src>

<mosaic_0001>
module attributes {stable_mosaic.version = 11 : i64} {
  func.func @_matmul_bias_kernel(%arg0: i32, %arg1: i32, %arg2: memref<128x27xbf16, #tpu.memory_space<vmem>>, %arg3: memref<27x128xbf16, #tpu.memory_space<vmem>>, %arg4: memref<1x128xf32, #tpu.memory_space<vmem>>, %arg5: memref<128x128xf32, #tpu.memory_space<vmem>>, %arg6: memref<128x128xf32, #tpu.memory_space<vmem>>) attributes {dimension_semantics = [#tpu.dimension_semantics<parallel>, #tpu.dimension_semantics<arbitrary>], iteration_bounds = array<i64: 1, 1>, scalar_prefetch = 0 : i64, scratch_operands = 1 : i64, tpu.core_type = #tpu.core_type<tc>, window_params = [{transform_indices = @transform_0, window_bounds = array<i64: 128, 27>}, {transform_indices = @transform_1, window_bounds = array<i64: 27, 128>}, {pipeline_mode = #tpu.pipeline_mode<synchronous>, transform_indices = @transform_2, window_bounds = array<i64: 1, 128>}, {transform_indices = @transform_3, window_bounds = array<i64: 128, 128>}]} {
    %c0_i32 = arith.constant 0 : i32
    %0 = arith.cmpi eq, %arg1, %c0_i32 : i32
    %1 = arith.extui %0 : i1 to i32
    %c0_i32_0 = arith.constant 0 : i32
    %2 = arith.cmpi ne, %1, %c0_i32_0 : i32
    scf.if %2 {
      %cst_10 = arith.constant 0.000000e+00 : f32
      %12 = vector.broadcast %cst_10 : f32 to vector<128x128xf32>
      %c0_11 = arith.constant 0 : index
      %c0_12 = arith.constant 0 : index
      %13 = vector.load %arg6[%c0_11, %c0_12] : memref<128x128xf32, #tpu.memory_space<vmem>>, vector<128x128xf32>
      tpu.vector_store %arg6[%c0_11, %c0_12], %12 {strides = array<i32>} : memref<128x128xf32, #tpu.memory_space<vmem>>, vector<128x128xf32>,
    } else {
    }
    %c0 = arith.constant 0 : index
    %c0_1 = arith.constant 0 : index
    %3 = vector.load %arg6[%c0, %c0_1] : memref<128x128xf32, #tpu.memory_space<vmem>>, vector<128x128xf32>
    %c0_2 = arith.constant 0 : index
    %c0_3 = arith.constant 0 : index
    %4 = vector.load %arg2[%c0_2, %c0_3] : memref<128x27xbf16, #tpu.memory_space<vmem>>, vector<128x27xbf16>
    %c0_4 = arith.constant 0 : index
    %c0_5 = arith.constant 0 : index
    %5 = vector.load %arg3[%c0_4, %c0_5] : memref<27x128xbf16, #tpu.memory_space<vmem>>, vector<27x128xbf16>
    %cst = arith.constant dense<0.000000e+00> : vector<128x128xf32>
    %6 = tpu.matmul %4, %5, %cst {dimension_numbers = #tpu.dot_dimension_numbers<[1], [0], [0], [1], [0, 0, 1, 1], [], []>} : vector<128x27xbf16>, vector<27x128xbf16>, vector<128x128xf32> -> vector<128x128xf32>
    %7 = arith.addf %3, %6 : vector<128x128xf32>
    %c0_6 = arith.constant 0 : index
    %c0_7 = arith.constant 0 : index
    %8 = vector.load %arg6[%c0_6, %c0_7] : memref<128x128xf32, #tpu.memory_space<vmem>>, vector<128x128xf32>
    tpu.vector_store %arg6[%c0_6, %c0_7], %7 {strides = array<i32>} : memref<128x128xf32, #tpu.memory_space<vmem>>, vector<128x128xf32>,
    %c0_i32_8 = arith.constant 0 : i32
    %9 = arith.cmpi eq, %arg1, %c0_i32_8 : i32
    %10 = arith.extui %9 : i1 to i32
    %c0_i32_9 = arith.constant 0 : i32
    %11 = arith.cmpi ne, %10, %c0_i32_9 : i32
    scf.if %11 {
      %c0_10 = arith.constant 0 : index
      %c0_11 = arith.constant 0 : index
      %12 = vector.load %arg6[%c0_10, %c0_11] : memref<128x128xf32, #tpu.memory_space<vmem>>, vector<128x128xf32>
      %c0_12 = arith.constant 0 : index
      %c0_13 = arith.constant 0 : index
      %13 = vector.load %arg4[%c0_12, %c0_13] : memref<1x128xf32, #tpu.memory_space<vmem>>, vector<1x128xf32>
      %14 = vector.broadcast %13 : vector<1x128xf32> to vector<128x128xf32>
      %15 = arith.addf %12, %14 : vector<128x128xf32>
      %cst_14 = arith.constant 0.000000e+00 : f32
      %16 = vector.broadcast %cst_14 : f32 to vector<128x128xf32>
      %17 = arith.maximumf %15, %16 : vector<128x128xf32>
      %c0_15 = arith.constant 0 : index
      %c0_16 = arith.constant 0 : index
      %18 = vector.load %arg5[%c0_15, %c0_16] : memref<128x128xf32, #tpu.memory_space<vmem>>, vector<128x128xf32>
      tpu.vector_store %arg5[%c0_15, %c0_16], %17 {strides = array<i32>} : memref<128x128xf32, #tpu.memory_space<vmem>>, vector<128x128xf32>,
    } else {
    }
    return
  }
  func.func @transform_0(%arg0: i32, %arg1: i32) -> (i32, i32) {
    %c0_i32 = arith.constant 0 : i32
    return %arg0, %arg1 : i32, i32
  }
  func.func @transform_1(%arg0: i32, %arg1: i32) -> (i32, i32) {
    %c0_i32 = arith.constant 0 : i32
    %c0_i32_0 = arith.constant 0 : i32
    return %arg1, %c0_i32 : i32, i32
  }
  func.func @transform_2(%arg0: i32, %arg1: i32) -> (i32, i32) {
    %c0_i32 = arith.constant 0 : i32
    %c0_i32_0 = arith.constant 0 : i32
    %c0_i32_1 = arith.constant 0 : i32
    return %c0_i32, %c0_i32_0 : i32, i32
  }
  func.func @transform_3(%arg0: i32, %arg1: i32) -> (i32, i32) {
    %c0_i32 = arith.constant 0 : i32
    %c0_i32_0 = arith.constant 0 : i32
    return %arg0, %c0_i32 : i32, i32
  }
}

module attributes {stable_mosaic.version = 11 : i64} {
  func.func @_matmul_bias_kernel(%arg0: i32, %arg1: i32, %arg2: memref<32x72xbf16, #tpu.memory_space<vmem>>, %arg3: memref<72x128xbf16, #tpu.memory_space<vmem>>, %arg4: memref<1x128xf32, #tpu.memory_space<vmem>>, %arg5: memref<32x128xf32, #tpu.memory_space<vmem>>, %arg6: memref<32x128xf32, #tpu.memory_space<vmem>>) attributes {dimension_semantics = [#tpu.dimension_semantics<parallel>, #tpu.dimension_semantics<arbitrary>], iteration_bounds = array<i64: 1, 1>, scalar_prefetch = 0 : i64, scratch_operands = 1 : i64, tpu.core_type = #tpu.core_type<tc>, window_params = [{transform_indices = @transform_0, window_bounds = array<i64: 32, 72>}, {transform_indices = @transform_1, window_bounds = array<i64: 72, 128>}, {pipeline_mode = #tpu.pipeline_mode<synchronous>, transform_indices = @transform_2, window_bounds = array<i64: 1, 128>}, {transform_indices = @transform_3, window_bounds = array<i64: 32, 128>}]} {
    %c0_i32 = arith.constant 0 : i32
    %0 = arith.cmpi eq, %arg1, %c0_i32 : i32
    %1 = arith.extui %0 : i1 to i32
    %c0_i32_0 = arith.constant 0 : i32
    %2 = arith.cmpi ne, %1, %c0_i32_0 : i32
    scf.if %2 {
      %cst_10 = arith.constant 0.000000e+00 : f32
      %12 = vector.broadcast %cst_10 : f32 to vector<32x128xf32>
      %c0_11 = arith.constant 0 : index
      %c0_12 = arith.constant 0 : index
      %13 = vector.load %arg6[%c0_11, %c0_12] : memref<32x128xf32, #tpu.memory_space<vmem>>, vector<32x128xf32>
      tpu.vector_store %arg6[%c0_11, %c0_12], %12 {strides = array<i32>} : memref<32x128xf32, #tpu.memory_space<vmem>>, vector<32x128xf32>,
    } else {
    }
    %c0 = arith.constant 0 : index
    %c0_1 = arith.constant 0 : index
    %3 = vector.load %arg6[%c0, %c0_1] : memref<32x128xf32, #tpu.memory_space<vmem>>, vector<32x128xf32>
    %c0_2 = arith.constant 0 : index
    %c0_3 = arith.constant 0 : index
    %4 = vector.load %arg2[%c0_2, %c0_3] : memref<32x72xbf16, #tpu.memory_space<vmem>>, vector<32x72xbf16>
    %c0_4 = arith.constant 0 : index
    %c0_5 = arith.constant 0 : index
    %5 = vector.load %arg3[%c0_4, %c0_5] : memref<72x128xbf16, #tpu.memory_space<vmem>>, vector<72x128xbf16>
    %cst = arith.constant dense<0.000000e+00> : vector<32x128xf32>
    %6 = tpu.matmul %4, %5, %cst {dimension_numbers = #tpu.dot_dimension_numbers<[1], [0], [0], [1], [0, 0, 1, 1], [], []>} : vector<32x72xbf16>, vector<72x128xbf16>, vector<32x128xf32> -> vector<32x128xf32>
    %7 = arith.addf %3, %6 : vector<32x128xf32>
    %c0_6 = arith.constant 0 : index
    %c0_7 = arith.constant 0 : index
    %8 = vector.load %arg6[%c0_6, %c0_7] : memref<32x128xf32, #tpu.memory_space<vmem>>, vector<32x128xf32>
    tpu.vector_store %arg6[%c0_6, %c0_7], %7 {strides = array<i32>} : memref<32x128xf32, #tpu.memory_space<vmem>>, vector<32x128xf32>,
    %c0_i32_8 = arith.constant 0 : i32
    %9 = arith.cmpi eq, %arg1, %c0_i32_8 : i32
    %10 = arith.extui %9 : i1 to i32
    %c0_i32_9 = arith.constant 0 : i32
    %11 = arith.cmpi ne, %10, %c0_i32_9 : i32
    scf.if %11 {
      %c0_10 = arith.constant 0 : index
      %c0_11 = arith.constant 0 : index
      %12 = vector.load %arg6[%c0_10, %c0_11] : memref<32x128xf32, #tpu.memory_space<vmem>>, vector<32x128xf32>
      %c0_12 = arith.constant 0 : index
      %c0_13 = arith.constant 0 : index
      %13 = vector.load %arg4[%c0_12, %c0_13] : memref<1x128xf32, #tpu.memory_space<vmem>>, vector<1x128xf32>
      %14 = vector.broadcast %13 : vector<1x128xf32> to vector<32x128xf32>
      %15 = arith.addf %12, %14 : vector<32x128xf32>
      %cst_14 = arith.constant 0.000000e+00 : f32
      %16 = vector.broadcast %cst_14 : f32 to vector<32x128xf32>
      %17 = arith.maximumf %15, %16 : vector<32x128xf32>
      %c0_15 = arith.constant 0 : index
      %c0_16 = arith.constant 0 : index
      %18 = vector.load %arg5[%c0_15, %c0_16] : memref<32x128xf32, #tpu.memory_space<vmem>>, vector<32x128xf32>
      tpu.vector_store %arg5[%c0_15, %c0_16], %17 {strides = array<i32>} : memref<32x128xf32, #tpu.memory_space<vmem>>, vector<32x128xf32>,
    } else {
    }
    return
  }
  func.func @transform_0(%arg0: i32, %arg1: i32) -> (i32, i32) {
    %c0_i32 = arith.constant 0 : i32
    return %arg0, %arg1 : i32, i32
  }
  func.func @transform_1(%arg0: i32, %arg1: i32) -> (i32, i32) {
    %c0_i32 = arith.constant 0 : i32
    %c0_i32_0 = arith.constant 0 : i32
    return %arg1, %c0_i32 : i32, i32
  }
  func.func @transform_2(%arg0: i32, %arg1: i32) -> (i32, i32) {
    %c0_i32 = arith.constant 0 : i32
    %c0_i32_0 = arith.constant 0 : i32
    %c0_i32_1 = arith.constant 0 : i32
    return %c0_i32, %c0_i32_0 : i32, i32
  }
  func.func @transform_3(%arg0: i32, %arg1: i32) -> (i32, i32) {
    %c0_i32 = arith.constant 0 : i32
    %c0_i32_0 = arith.constant 0 : i32
    return %arg0, %c0_i32 : i32, i32
  }
}

module attributes {stable_mosaic.version = 11 : i64} {
  func.func @_matmul_bias_kernel(%arg0: i32, %arg1: i32, %arg2: memref<16x72xbf16, #tpu.memory_space<vmem>>, %arg3: memref<72x128xbf16, #tpu.memory_space<vmem>>, %arg4: memref<1x128xf32, #tpu.memory_space<vmem>>, %arg5: memref<16x128xf32, #tpu.memory_space<vmem>>, %arg6: memref<16x128xf32, #tpu.memory_space<vmem>>) attributes {dimension_semantics = [#tpu.dimension_semantics<parallel>, #tpu.dimension_semantics<arbitrary>], iteration_bounds = array<i64: 1, 1>, scalar_prefetch = 0 : i64, scratch_operands = 1 : i64, tpu.core_type = #tpu.core_type<tc>, window_params = [{transform_indices = @transform_0, window_bounds = array<i64: 16, 72>}, {transform_indices = @transform_1, window_bounds = array<i64: 72, 128>}, {pipeline_mode = #tpu.pipeline_mode<synchronous>, transform_indices = @transform_2, window_bounds = array<i64: 1, 128>}, {transform_indices = @transform_3, window_bounds = array<i64: 16, 128>}]} {
    %c0_i32 = arith.constant 0 : i32
    %0 = arith.cmpi eq, %arg1, %c0_i32 : i32
    %1 = arith.extui %0 : i1 to i32
    %c0_i32_0 = arith.constant 0 : i32
    %2 = arith.cmpi ne, %1, %c0_i32_0 : i32
    scf.if %2 {
      %cst_10 = arith.constant 0.000000e+00 : f32
      %12 = vector.broadcast %cst_10 : f32 to vector<16x128xf32>
      %c0_11 = arith.constant 0 : index
      %c0_12 = arith.constant 0 : index
      %13 = vector.load %arg6[%c0_11, %c0_12] : memref<16x128xf32, #tpu.memory_space<vmem>>, vector<16x128xf32>
      tpu.vector_store %arg6[%c0_11, %c0_12], %12 {strides = array<i32>} : memref<16x128xf32, #tpu.memory_space<vmem>>, vector<16x128xf32>,
    } else {
    }
    %c0 = arith.constant 0 : index
    %c0_1 = arith.constant 0 : index
    %3 = vector.load %arg6[%c0, %c0_1] : memref<16x128xf32, #tpu.memory_space<vmem>>, vector<16x128xf32>
    %c0_2 = arith.constant 0 : index
    %c0_3 = arith.constant 0 : index
    %4 = vector.load %arg2[%c0_2, %c0_3] : memref<16x72xbf16, #tpu.memory_space<vmem>>, vector<16x72xbf16>
    %c0_4 = arith.constant 0 : index
    %c0_5 = arith.constant 0 : index
    %5 = vector.load %arg3[%c0_4, %c0_5] : memref<72x128xbf16, #tpu.memory_space<vmem>>, vector<72x128xbf16>
    %cst = arith.constant dense<0.000000e+00> : vector<16x128xf32>
    %6 = tpu.matmul %4, %5, %cst {dimension_numbers = #tpu.dot_dimension_numbers<[1], [0], [0], [1], [0, 0, 1, 1], [], []>} : vector<16x72xbf16>, vector<72x128xbf16>, vector<16x128xf32> -> vector<16x128xf32>
    %7 = arith.addf %3, %6 : vector<16x128xf32>
    %c0_6 = arith.constant 0 : index
    %c0_7 = arith.constant 0 : index
    %8 = vector.load %arg6[%c0_6, %c0_7] : memref<16x128xf32, #tpu.memory_space<vmem>>, vector<16x128xf32>
    tpu.vector_store %arg6[%c0_6, %c0_7], %7 {strides = array<i32>} : memref<16x128xf32, #tpu.memory_space<vmem>>, vector<16x128xf32>,
    %c0_i32_8 = arith.constant 0 : i32
    %9 = arith.cmpi eq, %arg1, %c0_i32_8 : i32
    %10 = arith.extui %9 : i1 to i32
    %c0_i32_9 = arith.constant 0 : i32
    %11 = arith.cmpi ne, %10, %c0_i32_9 : i32
    scf.if %11 {
      %c0_10 = arith.constant 0 : index
      %c0_11 = arith.constant 0 : index
      %12 = vector.load %arg6[%c0_10, %c0_11] : memref<16x128xf32, #tpu.memory_space<vmem>>, vector<16x128xf32>
      %c0_12 = arith.constant 0 : index
      %c0_13 = arith.constant 0 : index
      %13 = vector.load %arg4[%c0_12, %c0_13] : memref<1x128xf32, #tpu.memory_space<vmem>>, vector<1x128xf32>
      %14 = vector.broadcast %13 : vector<1x128xf32> to vector<16x128xf32>
      %15 = arith.addf %12, %14 : vector<16x128xf32>
      %cst_14 = arith.constant 0.000000e+00 : f32
      %16 = vector.broadcast %cst_14 : f32 to vector<16x128xf32>
      %17 = arith.maximumf %15, %16 : vector<16x128xf32>
      %c0_15 = arith.constant 0 : index
      %c0_16 = arith.constant 0 : index
      %18 = vector.load %arg5[%c0_15, %c0_16] : memref<16x128xf32, #tpu.memory_space<vmem>>, vector<16x128xf32>
      tpu.vector_store %arg5[%c0_15, %c0_16], %17 {strides = array<i32>} : memref<16x128xf32, #tpu.memory_space<vmem>>, vector<16x128xf32>,
    } else {
    }
    return
  }
  func.func @transform_0(%arg0: i32, %arg1: i32) -> (i32, i32) {
    %c0_i32 = arith.constant 0 : i32
    return %arg0, %arg1 : i32, i32
  }
  func.func @transform_1(%arg0: i32, %arg1: i32) -> (i32, i32) {
    %c0_i32 = arith.constant 0 : i32
    %c0_i32_0 = arith.constant 0 : i32
    return %arg1, %c0_i32 : i32, i32
  }
  func.func @transform_2(%arg0: i32, %arg1: i32) -> (i32, i32) {
    %c0_i32 = arith.constant 0 : i32
    %c0_i32_0 = arith.constant 0 : i32
    %c0_i32_1 = arith.constant 0 : i32
    return %c0_i32, %c0_i32_0 : i32, i32
  }
  func.func @transform_3(%arg0: i32, %arg1: i32) -> (i32, i32) {
    %c0_i32 = arith.constant 0 : i32
    %c0_i32_0 = arith.constant 0 : i32
    return %arg0, %c0_i32 : i32, i32
  }
}

module attributes {stable_mosaic.version = 11 : i64} {
  func.func @_matmul_bias_kernel(%arg0: i32, %arg1: i32, %arg2: memref<16x144xbf16, #tpu.memory_space<vmem>>, %arg3: memref<144x128xbf16, #tpu.memory_space<vmem>>, %arg4: memref<1x128xf32, #tpu.memory_space<vmem>>, %arg5: memref<16x128xf32, #tpu.memory_space<vmem>>, %arg6: memref<16x128xf32, #tpu.memory_space<vmem>>) attributes {dimension_semantics = [#tpu.dimension_semantics<parallel>, #tpu.dimension_semantics<arbitrary>], iteration_bounds = array<i64: 1, 1>, scalar_prefetch = 0 : i64, scratch_operands = 1 : i64, tpu.core_type = #tpu.core_type<tc>, window_params = [{transform_indices = @transform_0, window_bounds = array<i64: 16, 144>}, {transform_indices = @transform_1, window_bounds = array<i64: 144, 128>}, {pipeline_mode = #tpu.pipeline_mode<synchronous>, transform_indices = @transform_2, window_bounds = array<i64: 1, 128>}, {transform_indices = @transform_3, window_bounds = array<i64: 16, 128>}]} {
    %c0_i32 = arith.constant 0 : i32
    %0 = arith.cmpi eq, %arg1, %c0_i32 : i32
    %1 = arith.extui %0 : i1 to i32
    %c0_i32_0 = arith.constant 0 : i32
    %2 = arith.cmpi ne, %1, %c0_i32_0 : i32
    scf.if %2 {
      %cst_10 = arith.constant 0.000000e+00 : f32
      %12 = vector.broadcast %cst_10 : f32 to vector<16x128xf32>
      %c0_11 = arith.constant 0 : index
      %c0_12 = arith.constant 0 : index
      %13 = vector.load %arg6[%c0_11, %c0_12] : memref<16x128xf32, #tpu.memory_space<vmem>>, vector<16x128xf32>
      tpu.vector_store %arg6[%c0_11, %c0_12], %12 {strides = array<i32>} : memref<16x128xf32, #tpu.memory_space<vmem>>, vector<16x128xf32>,
    } else {
    }
    %c0 = arith.constant 0 : index
    %c0_1 = arith.constant 0 : index
    %3 = vector.load %arg6[%c0, %c0_1] : memref<16x128xf32, #tpu.memory_space<vmem>>, vector<16x128xf32>
    %c0_2 = arith.constant 0 : index
    %c0_3 = arith.constant 0 : index
    %4 = vector.load %arg2[%c0_2, %c0_3] : memref<16x144xbf16, #tpu.memory_space<vmem>>, vector<16x144xbf16>
    %c0_4 = arith.constant 0 : index
    %c0_5 = arith.constant 0 : index
    %5 = vector.load %arg3[%c0_4, %c0_5] : memref<144x128xbf16, #tpu.memory_space<vmem>>, vector<144x128xbf16>
    %cst = arith.constant dense<0.000000e+00> : vector<16x128xf32>
    %6 = tpu.matmul %4, %5, %cst {dimension_numbers = #tpu.dot_dimension_numbers<[1], [0], [0], [1], [0, 0, 1, 1], [], []>} : vector<16x144xbf16>, vector<144x128xbf16>, vector<16x128xf32> -> vector<16x128xf32>
    %7 = arith.addf %3, %6 : vector<16x128xf32>
    %c0_6 = arith.constant 0 : index
    %c0_7 = arith.constant 0 : index
    %8 = vector.load %arg6[%c0_6, %c0_7] : memref<16x128xf32, #tpu.memory_space<vmem>>, vector<16x128xf32>
    tpu.vector_store %arg6[%c0_6, %c0_7], %7 {strides = array<i32>} : memref<16x128xf32, #tpu.memory_space<vmem>>, vector<16x128xf32>,
    %c0_i32_8 = arith.constant 0 : i32
    %9 = arith.cmpi eq, %arg1, %c0_i32_8 : i32
    %10 = arith.extui %9 : i1 to i32
    %c0_i32_9 = arith.constant 0 : i32
    %11 = arith.cmpi ne, %10, %c0_i32_9 : i32
    scf.if %11 {
      %c0_10 = arith.constant 0 : index
      %c0_11 = arith.constant 0 : index
      %12 = vector.load %arg6[%c0_10, %c0_11] : memref<16x128xf32, #tpu.memory_space<vmem>>, vector<16x128xf32>
      %c0_12 = arith.constant 0 : index
      %c0_13 = arith.constant 0 : index
      %13 = vector.load %arg4[%c0_12, %c0_13] : memref<1x128xf32, #tpu.memory_space<vmem>>, vector<1x128xf32>
      %14 = vector.broadcast %13 : vector<1x128xf32> to vector<16x128xf32>
      %15 = arith.addf %12, %14 : vector<16x128xf32>
      %cst_14 = arith.constant 0.000000e+00 : f32
      %16 = vector.broadcast %cst_14 : f32 to vector<16x128xf32>
      %17 = arith.maximumf %15, %16 : vector<16x128xf32>
      %c0_15 = arith.constant 0 : index
      %c0_16 = arith.constant 0 : index
      %18 = vector.load %arg5[%c0_15, %c0_16] : memref<16x128xf32, #tpu.memory_space<vmem>>, vector<16x128xf32>
      tpu.vector_store %arg5[%c0_15, %c0_16], %17 {strides = array<i32>} : memref<16x128xf32, #tpu.memory_space<vmem>>, vector<16x128xf32>,
    } else {
    }
    return
  }
  func.func @transform_0(%arg0: i32, %arg1: i32) -> (i32, i32) {
    %c0_i32 = arith.constant 0 : i32
    return %arg0, %arg1 : i32, i32
  }
  func.func @transform_1(%arg0: i32, %arg1: i32) -> (i32, i32) {
    %c0_i32 = arith.constant 0 : i32
    %c0_i32_0 = arith.constant 0 : i32
    return %arg1, %c0_i32 : i32, i32
  }
  func.func @transform_2(%arg0: i32, %arg1: i32) -> (i32, i32) {
    %c0_i32 = arith.constant 0 : i32
    %c0_i32_0 = arith.constant 0 : i32
    %c0_i32_1 = arith.constant 0 : i32
    return %c0_i32, %c0_i32_0 : i32, i32
  }
  func.func @transform_3(%arg0: i32, %arg1: i32) -> (i32, i32) {
    %c0_i32 = arith.constant 0 : i32
    %c0_i32_0 = arith.constant 0 : i32
    return %arg0, %c0_i32 : i32, i32
  }
}

module attributes {stable_mosaic.version = 11 : i64} {
  func.func @_matmul_bias_kernel(%arg0: i32, %arg1: i32, %arg2: memref<16x32xbf16, #tpu.memory_space<vmem>>, %arg3: memref<32x128xbf16, #tpu.memory_space<vmem>>, %arg4: memref<1x128xf32, #tpu.memory_space<vmem>>, %arg5: memref<16x128xf32, #tpu.memory_space<vmem>>, %arg6: memref<16x128xf32, #tpu.memory_space<vmem>>) attributes {dimension_semantics = [#tpu.dimension_semantics<parallel>, #tpu.dimension_semantics<arbitrary>], iteration_bounds = array<i64: 1, 1>, scalar_prefetch = 0 : i64, scratch_operands = 1 : i64, tpu.core_type = #tpu.core_type<tc>, window_params = [{transform_indices = @transform_0, window_bounds = array<i64: 16, 32>}, {transform_indices = @transform_1, window_bounds = array<i64: 32, 128>}, {pipeline_mode = #tpu.pipeline_mode<synchronous>, transform_indices = @transform_2, window_bounds = array<i64: 1, 128>}, {transform_indices = @transform_3, window_bounds = array<i64: 16, 128>}]} {
    %c0_i32 = arith.constant 0 : i32
    %0 = arith.cmpi eq, %arg1, %c0_i32 : i32
    %1 = arith.extui %0 : i1 to i32
    %c0_i32_0 = arith.constant 0 : i32
    %2 = arith.cmpi ne, %1, %c0_i32_0 : i32
    scf.if %2 {
      %cst_10 = arith.constant 0.000000e+00 : f32
      %12 = vector.broadcast %cst_10 : f32 to vector<16x128xf32>
      %c0_11 = arith.constant 0 : index
      %c0_12 = arith.constant 0 : index
      %13 = vector.load %arg6[%c0_11, %c0_12] : memref<16x128xf32, #tpu.memory_space<vmem>>, vector<16x128xf32>
      tpu.vector_store %arg6[%c0_11, %c0_12], %12 {strides = array<i32>} : memref<16x128xf32, #tpu.memory_space<vmem>>, vector<16x128xf32>,
    } else {
    }
    %c0 = arith.constant 0 : index
    %c0_1 = arith.constant 0 : index
    %3 = vector.load %arg6[%c0, %c0_1] : memref<16x128xf32, #tpu.memory_space<vmem>>, vector<16x128xf32>
    %c0_2 = arith.constant 0 : index
    %c0_3 = arith.constant 0 : index
    %4 = vector.load %arg2[%c0_2, %c0_3] : memref<16x32xbf16, #tpu.memory_space<vmem>>, vector<16x32xbf16>
    %c0_4 = arith.constant 0 : index
    %c0_5 = arith.constant 0 : index
    %5 = vector.load %arg3[%c0_4, %c0_5] : memref<32x128xbf16, #tpu.memory_space<vmem>>, vector<32x128xbf16>
    %cst = arith.constant dense<0.000000e+00> : vector<16x128xf32>
    %6 = tpu.matmul %4, %5, %cst {dimension_numbers = #tpu.dot_dimension_numbers<[1], [0], [0], [1], [0, 0, 1, 1], [], []>} : vector<16x32xbf16>, vector<32x128xbf16>, vector<16x128xf32> -> vector<16x128xf32>
    %7 = arith.addf %3, %6 : vector<16x128xf32>
    %c0_6 = arith.constant 0 : index
    %c0_7 = arith.constant 0 : index
    %8 = vector.load %arg6[%c0_6, %c0_7] : memref<16x128xf32, #tpu.memory_space<vmem>>, vector<16x128xf32>
    tpu.vector_store %arg6[%c0_6, %c0_7], %7 {strides = array<i32>} : memref<16x128xf32, #tpu.memory_space<vmem>>, vector<16x128xf32>,
    %c0_i32_8 = arith.constant 0 : i32
    %9 = arith.cmpi eq, %arg1, %c0_i32_8 : i32
    %10 = arith.extui %9 : i1 to i32
    %c0_i32_9 = arith.constant 0 : i32
    %11 = arith.cmpi ne, %10, %c0_i32_9 : i32
    scf.if %11 {
      %c0_10 = arith.constant 0 : index
      %c0_11 = arith.constant 0 : index
      %12 = vector.load %arg6[%c0_10, %c0_11] : memref<16x128xf32, #tpu.memory_space<vmem>>, vector<16x128xf32>
      %c0_12 = arith.constant 0 : index
      %c0_13 = arith.constant 0 : index
      %13 = vector.load %arg4[%c0_12, %c0_13] : memref<1x128xf32, #tpu.memory_space<vmem>>, vector<1x128xf32>
      %14 = vector.broadcast %13 : vector<1x128xf32> to vector<16x128xf32>
      %15 = arith.addf %12, %14 : vector<16x128xf32>
      %c0_14 = arith.constant 0 : index
      %c0_15 = arith.constant 0 : index
      %16 = vector.load %arg5[%c0_14, %c0_15] : memref<16x128xf32, #tpu.memory_space<vmem>>, vector<16x128xf32>
      tpu.vector_store %arg5[%c0_14, %c0_15], %15 {strides = array<i32>} : memref<16x128xf32, #tpu.memory_space<vmem>>, vector<16x128xf32>,
    } else {
    }
    return
  }
  func.func @transform_0(%arg0: i32, %arg1: i32) -> (i32, i32) {
    %c0_i32 = arith.constant 0 : i32
    return %arg0, %arg1 : i32, i32
  }
  func.func @transform_1(%arg0: i32, %arg1: i32) -> (i32, i32) {
    %c0_i32 = arith.constant 0 : i32
    %c0_i32_0 = arith.constant 0 : i32
    return %arg1, %c0_i32 : i32, i32
  }
  func.func @transform_2(%arg0: i32, %arg1: i32) -> (i32, i32) {
    %c0_i32 = arith.constant 0 : i32
    %c0_i32_0 = arith.constant 0 : i32
    %c0_i32_1 = arith.constant 0 : i32
    return %c0_i32, %c0_i32_0 : i32, i32
  }
  func.func @transform_3(%arg0: i32, %arg1: i32) -> (i32, i32) {
    %c0_i32 = arith.constant 0 : i32
    %c0_i32_0 = arith.constant 0 : i32
    return %arg0, %c0_i32 : i32, i32
  }
}

</mosaic_0001>

<bundles_post_ra>
// kernel: mtfcn_forward.5
= control target key start
LH: loop header
LB: loop body
LE: loop exit
PB: predicated region body
PF: predicated region fallthrough
CT: control target
= control target key end

     0   :  { %vm147_vm0 = vcmask 1044480   ;;  %vm148_vm1 = vcmask 1045504   ;;  %v425_v1 = vmov 65535   ;;  %vm122_vm2 = vcmask 220160   ;;  %s535_s1 = inlined_call_operand.vmem [shape: bf16[27,128], index: 1, kind: input, shape index: {}]   ;;  %s536_s0 = inlined_call_operand.vmem [shape: bf16[128,27], index: 0, kind: input, shape index: {}]   ;;  %s537_s2 = inlined_call_operand.vmem [shape: f32[1,128], index: 2, kind: input, shape index: {}]   ;;  %s538_s3 = inlined_call_operand.vmem [shape: f32[128,128], index: 3, kind: output, shape index: {}]  }
   0x1   :  { %v415_v0 = vld [vmem:[%s535_s1 + $0x8] sm:$0x3f]   ;;  %v149_v2 = vsel %vm147_vm0, 4294967295, %v425_v1  ;;  %v417_v4 = vld [vmem:[%s536_s0] sm:$0xff]   ;;  %v421_v10 = vld [vmem:[%s536_s0 + $0x10] sm:$0xff]  }
   0x2   :  { %v150_v3 = vsel %vm148_vm1, %v149_v2, 0  ;;  %v416_v6 = vld [vmem:[%s535_s1] sm:$0xff]   ;;  %394 = vmatprep.mubr.msk.bf16.mxu0 %vm122_vm2, %v417_v4  ;;  %v419_v8 = vld [vmem:[%s536_s0 + $0x8] sm:$0xff]   ;;  %v422_v11 = vld [vmem:[%s536_s0 + $0x30] sm:$0xff]  }
   0x3   :  { %v152_v5 = vand.u32 %v415_v0, %v150_v3  ;;  %v418_v7 = vld [vmem:[%s536_s0 + $0x20] sm:$0xff]   ;;  %v420_v9 = vld [vmem:[%s536_s0 + $0x28] sm:$0xff]   ;;  %v423_v12 = vld [vmem:[%s536_s0 + $0x18] sm:$0xff]  }
   0x4   :  { %402 = vmatprep.mubr.msk.bf16.mxu1 %vm122_vm2, %v418_v7  ;;  %v424_v13 = vld [vmem:[%s536_s0 + $0x38] sm:$0xff]   ;;  %v379_v14 = vld [vmem:[%s537_s2] ss:$0 sm:$0xff] }
   0x5   :  { %390 = vmatprep.subr.bf16.mxu0 %v152_v5  ;;  %410 = vmatprep.subr.bf16.mxu1 %v152_v5 }
   0x6   :  { %391 = vmatpush3.bf16.msra.mxu0 %v152_v5  ;;  %412 = vmatpush3.bf16.msra.mxu1 %v152_v5 }
   0x7   :  { %392 = vmatprep.subr.bf16.mxu0 %v416_v6  ;;  %411 = vmatprep.subr.bf16.mxu1 %v416_v6 }
   0xa   :  { %393 = vmatpush3.bf16.msra.mxu0 %v416_v6  ;;  %413 = vmatpush3.bf16.msra.mxu1 %v416_v6 }
   0xd   :  { %395 = vmatmul.mubr.msk.bf16.vlgmr.msra.gmra.mxu0 %vm122_vm2, %v419_v8  ;;  %403 = vmatmul.mubr.msk.bf16.vlgmr.msra.gmra.mxu1 %vm122_vm2, %v420_v9 }
   0xe   :  { %398 = vmatprep.mubr.msk.bf16.mxu0 %vm122_vm2, %v421_v10  ;;  %406 = vmatprep.mubr.msk.bf16.mxu1 %vm122_vm2, %v422_v11 }
  0x15   :  { %399 = vmatmul.mubr.msk.bf16.gmra.mxu0 %vm122_vm2, %v423_v12  ;;  %407 = vmatmul.mubr.msk.bf16.gmra.mxu1 %vm122_vm2, %v424_v13 }
  0xcd   :  { %v396_v15 = vpop.f32.mrf.mxu0  ;;  %v404_v16 = vpop.f32.mrf.mxu1 }
  0xce   :  { %v311_v17 = vadd.f32 %v396_v15, %v379_v14  ;;  %v319_v18 = vadd.f32 %v404_v16, %v379_v14 }
  0xcf   :  { %v188_v19 = vpop.f32.mrf.mxu0  ;;  %v220_v20 = vpop.f32.mrf.mxu1 }
  0xd0   :  { %v327_v21 = vmax.f32 %v311_v17, 0.0  ;;  %v335_v22 = vmax.f32 %v319_v18, 0.0  ;;  %v309_v23 = vadd.f32 %v379_v14, %v188_v19  ;;  %v317_v24 = vadd.f32 %v379_v14, %v220_v20 }
  0xd1   :  { %v397_v25 = vpop.f32.mrf.mxu0  ;;  %v405_v26 = vpop.f32.mrf.mxu1 }
  0xd2   :  { %343 = vst [vmem:[%s538_s3 + $0x10] sm:$0xff] %v327_v21  ;;  %351 = vst [vmem:[%s538_s3 + $0x50] sm:$0xff] %v335_v22  ;;  %v325_v27 = vmax.f32 %v309_v23, 0.0  ;;  %v333_v28 = vmax.f32 %v317_v24, 0.0  ;;  %v312_v29 = vadd.f32 %v397_v25, %v379_v14  ;;  %v320_v30 = vadd.f32 %v405_v26, %v379_v14 }
  0xd3   :  { %v191_v31 = vpop.f32.mrf.mxu0  ;;  %v223_v32 = vpop.f32.mrf.mxu1 }
  0xd4   :  { %341 = vst [vmem:[%s538_s3] sm:$0xff] %v325_v27  ;;  %349 = vst [vmem:[%s538_s3 + $0x40] sm:$0xff] %v333_v28  ;;  %v328_v33 = vmax.f32 %v312_v29, 0.0  ;;  %v336_v34 = vmax.f32 %v320_v30, 0.0  ;;  %v310_v35 = vadd.f32 %v379_v14, %v191_v31  ;;  %v318_v36 = vadd.f32 %v379_v14, %v223_v32 }
  0xd5   :  { %v400_v37 = vpop.f32.mrf.mxu0  ;;  %v408_v38 = vpop.f32.mrf.mxu1 }
  0xd6   :  { %344 = vst [vmem:[%s538_s3 + $0x18] sm:$0xff] %v328_v33  ;;  %352 = vst [vmem:[%s538_s3 + $0x58] sm:$0xff] %v336_v34  ;;  %v326_v39 = vmax.f32 %v310_v35, 0.0  ;;  %v334_v40 = vmax.f32 %v318_v36, 0.0  ;;  %v315_v41 = vadd.f32 %v400_v37, %v379_v14  ;;  %v323_v42 = vadd.f32 %v408_v38, %v379_v14 }
  0xd7   :  { %v204_v43 = vpop.f32.mrf.mxu0  ;;  %v236_v44 = vpop.f32.mrf.mxu1 }
  0xd8   :  { %342 = vst [vmem:[%s538_s3 + $0x8] sm:$0xff] %v326_v39  ;;  %350 = vst [vmem:[%s538_s3 + $0x48] sm:$0xff] %v334_v40  ;;  %v331_v45 = vmax.f32 %v315_v41, 0.0  ;;  %v339_v46 = vmax.f32 %v323_v42, 0.0  ;;  %v313_v47 = vadd.f32 %v379_v14, %v204_v43  ;;  %v321_v48 = vadd.f32 %v379_v14, %v236_v44 }
  0xd9   :  { %v401_v49 = vpop.f32.mrf.mxu0  ;;  %v409_v50 = vpop.f32.mrf.mxu1 }
  0xda   :  { %347 = vst [vmem:[%s538_s3 + $0x30] sm:$0xff] %v331_v45  ;;  %355 = vst [vmem:[%s538_s3 + $0x70] sm:$0xff] %v339_v46  ;;  %v329_v51 = vmax.f32 %v313_v47, 0.0  ;;  %v337_v52 = vmax.f32 %v321_v48, 0.0  ;;  %v316_v53 = vadd.f32 %v401_v49, %v379_v14  ;;  %v324_v54 = vadd.f32 %v409_v50, %v379_v14 }
  0xdb   :  { %v207_v55 = vpop.f32.mrf.mxu0  ;;  %v239_v56 = vpop.f32.mrf.mxu1 }
  0xdc   :  { %345 = vst [vmem:[%s538_s3 + $0x20] sm:$0xff] %v329_v51  ;;  %353 = vst [vmem:[%s538_s3 + $0x60] sm:$0xff] %v337_v52  ;;  %v332_v57 = vmax.f32 %v316_v53, 0.0  ;;  %v340_v58 = vmax.f32 %v324_v54, 0.0  ;;  %v314_v59 = vadd.f32 %v379_v14, %v207_v55  ;;  %v322_v60 = vadd.f32 %v379_v14, %v239_v56 }
  0xde   :  { %348 = vst [vmem:[%s538_s3 + $0x38] sm:$0xff] %v332_v57  ;;  %356 = vst [vmem:[%s538_s3 + $0x78] sm:$0xff] %v340_v58  ;;  %v330_v61 = vmax.f32 %v314_v59, 0.0  ;;  %v338_v62 = vmax.f32 %v322_v60, 0.0 }
  0xe0   :  { %346 = vst [vmem:[%s538_s3 + $0x28] sm:$0xff] %v330_v61  ;;  %354 = vst [vmem:[%s538_s3 + $0x68] sm:$0xff] %v338_v62 }

// kernel: mtfcn_forward.6
= control target key start
LH: loop header
LB: loop body
LE: loop exit
PB: predicated region body
PF: predicated region fallthrough
CT: control target
= control target key end

     0   :  { %vm84_vm0 = vcmask 1043456   ;;  %vm77_vm1 = vcmask 588800   ;;  %s270_s1 = inlined_call_operand.vmem [shape: bf16[72,128], index: 1, kind: input, shape index: {}]   ;;  %s271_s0 = inlined_call_operand.vmem [shape: bf16[32,72], index: 0, kind: input, shape index: {}]   ;;  %s272_s2 = inlined_call_operand.vmem [shape: f32[1,128], index: 2, kind: input, shape index: {}]   ;;  %s273_s3 = inlined_call_operand.vmem [shape: f32[32,128], index: 3, kind: output, shape index: {}]  }
   0x1   :  { %v207_v0 = vld [vmem:[%s270_s1 + $0x20] ss:$0 sps:$4 sm:$0xff]   ;;  %v208_v1 = vld [vmem:[%s270_s1 + $0x18] sm:$0xff]   ;;  %v209_v3 = vld [vmem:[%s270_s1 + $0x10] sm:$0xff]  }
   0x2   :  { %206 = vmatprep.subr.msk.bf16.mxu0 %vm84_vm0, %v207_v0  ;;  %v86_v2 = vsel %vm84_vm0, %v207_v0, 0  ;;  %v212_v4 = vld [vmem:[%s271_s0] sm:$0xff]   ;;  %v210_v5 = vld [vmem:[%s270_s1 + $0x8] sm:$0xff]  }
   0x3   :  { %193 = vmatpush3.bf16.msra.mxu0 %v86_v2  ;;  %202 = vmatprep.mubr.msk.bf16.mxu0 %vm77_vm1, %v212_v4  ;;  %v211_v6 = vld [vmem:[%s270_s1] sm:$0xff]   ;;  %v213_v7 = vld [vmem:[%s271_s0 + $0x8] sm:$0xff]  }
   0x4   :  { %194 = vmatprep.subr.bf16.mxu0 %v208_v1  ;;  %v184_v8 = vld [vmem:[%s272_s2] ss:$0 sm:$0xff] }
   0x7   :  { %195 = vmatpush3.bf16.msra.mxu0 %v208_v1 }
   0x8   :  { %196 = vmatprep.subr.bf16.mxu0 %v209_v3 }
   0xb   :  { %197 = vmatpush3.bf16.msra.mxu0 %v209_v3 }
   0xc   :  { %198 = vmatprep.subr.bf16.mxu0 %v210_v5 }
   0xf   :  { %199 = vmatpush3.bf16.msra.mxu0 %v210_v5 }
  0x10   :  { %200 = vmatprep.subr.bf16.mxu0 %v211_v6 }
  0x13   :  { %201 = vmatpush3.bf16.msra.mxu0 %v211_v6 }
  0x16   :  { %203 = vmatmul.mubr.msk.bf16.vlgmr.msra.gmra.mxu0 %vm77_vm1, %v213_v7 }
  0xd6   :  { %v204_v9 = vpop.f32.mrf.mxu0 }
  0xd7   :  { %v161_v10 = vadd.f32 %v204_v9, %v184_v8 }
  0xd8   :  { %v122_v11 = vpop.f32.mrf.mxu0 }
  0xd9   :  { %v165_v12 = vmax.f32 %v161_v10, 0.0  ;;  %v159_v13 = vadd.f32 %v184_v8, %v122_v11 }
  0xda   :  { %v205_v14 = vpop.f32.mrf.mxu0 }
  0xdb   :  { %169 = vst [vmem:[%s273_s3 + $0x10] sm:$0xff] %v165_v12  ;;  %v163_v15 = vmax.f32 %v159_v13, 0.0  ;;  %v162_v16 = vadd.f32 %v205_v14, %v184_v8 }
  0xdc   :  { %v125_v17 = vpop.f32.mrf.mxu0 }
  0xdd   :  { %167 = vst [vmem:[%s273_s3] sm:$0xff] %v163_v15  ;;  %v166_v18 = vmax.f32 %v162_v16, 0.0  ;;  %v160_v19 = vadd.f32 %v184_v8, %v125_v17 }
  0xdf   :  { %170 = vst [vmem:[%s273_s3 + $0x18] sm:$0xff] %v166_v18  ;;  %v164_v20 = vmax.f32 %v160_v19, 0.0 }
  0xe1   :  { %168 = vst [vmem:[%s273_s3 + $0x8] sm:$0xff] %v164_v20 }

// kernel: mtfcn_forward.7
= control target key start
LH: loop header
LB: loop body
LE: loop exit
PB: predicated region body
PF: predicated region fallthrough
CT: control target
= control target key end

     0   :  { %vm70_vm0 = vcmask 1043456   ;;  %v177_v0 = vmov 0.0   ;;  %vm178_vm1 = vmmov 0   ;;  %vm66_vm2 = vcmask 588800   ;;  %s226_s1 = inlined_call_operand.vmem [shape: bf16[72,128], index: 1, kind: input, shape index: {}]   ;;  %s227_s0 = inlined_call_operand.vmem [shape: bf16[16,72], index: 0, kind: input, shape index: {}]   ;;  %s228_s2 = inlined_call_operand.vmem [shape: f32[1,128], index: 2, kind: input, shape index: {}]   ;;  %s229_s3 = inlined_call_operand.vmem [shape: f32[16,128], index: 3, kind: output, shape index: {}]  }
   0x1   :  { %155 = vmatprep.subr.bf16.mxu0 %v177_v0  ;;  %v171_v1 = vld [vmem:[%s226_s1 + $0x20] ss:$0 sps:$4 sm:$0xff]   ;;  %165 = vmatprep.mubr.msk.bf16.mxu0 %vm178_vm1, %v177_v0  ;;  %v172_v3 = vld [vmem:[%s226_s1 + $0x18] sm:$0xff]   ;;  %v173_v4 = vld [vmem:[%s226_s1 + $0x10] sm:$0xff]  }
   0x2   :  { %v72_v2 = vsel %vm70_vm0, %v171_v1, 0  ;;  %v174_v5 = vld [vmem:[%s226_s1 + $0x8] sm:$0xff]   ;;  %v175_v6 = vld [vmem:[%s226_s1] sm:$0xff]  }
   0x3   :  { %156 = vmatpush3.bf16.msra.mxu0 %v72_v2  ;;  %v176_v7 = vld [vmem:[%s227_s0] sm:$0xff]  }
   0x4   :  { %157 = vmatprep.subr.bf16.mxu0 %v177_v0  ;;  %v148_v8 = vld [vmem:[%s228_s2] ss:$0 sm:$0xff] }
   0x7   :  { %158 = vmatpush3.bf16.msra.mxu0 %v172_v3 }
   0x8   :  { %159 = vmatprep.subr.bf16.mxu0 %v177_v0 }
   0xb   :  { %160 = vmatpush3.bf16.msra.mxu0 %v173_v4 }
   0xc   :  { %161 = vmatprep.subr.bf16.mxu0 %v177_v0 }
   0xf   :  { %162 = vmatpush3.bf16.msra.mxu0 %v174_v5 }
  0x10   :  { %163 = vmatprep.subr.bf16.mxu0 %v177_v0 }
  0x13   :  { %164 = vmatpush3.bf16.msra.mxu0 %v175_v6 }
  0x16   :  { %166 = vmatmul.mubr.msk.bf16.vlgmr.msra.gmra.mxu0 %vm66_vm2, %v176_v7 }
  0xd6   :  { %v108_v9 = vpop.f32.mrf.mxu0 }
  0xd7   :  { %v131_v10 = vadd.f32 %v148_v8, %v108_v9 }
  0xd8   :  { %v167_v11 = vpop.f32.mrf.mxu0 }
  0xd9   :  { %v133_v12 = vmax.f32 %v131_v10, 0.0 }
  0xda   :  { %v111_v13 = vpop.f32.mrf.mxu0 }
  0xdb   :  { %135 = vst [vmem:[%s229_s3] sm:$0xff] %v133_v12  ;;  %v132_v14 = vadd.f32 %v148_v8, %v111_v13 }
  0xdc   :  { %v168_v15 = vpop.f32.mrf.mxu0 }
  0xdd   :  { %v134_v16 = vmax.f32 %v132_v14, 0.0 }
  0xdf   :  { %136 = vst [vmem:[%s229_s3 + $0x8] sm:$0xff] %v134_v16 }

// kernel: mtfcn_forward.8
= control target key start
LH: loop header
LB: loop body
LE: loop exit
PB: predicated region body
PF: predicated region fallthrough
CT: control target
= control target key end

     0   :  { %v203_v0 = vmov 0   ;;  %vm106_vm0 = vcmask 130048   ;;  %s266_s1 = inlined_call_operand.vmem [shape: bf16[144,128], index: 1, kind: input, shape index: {}]   ;;  %s267_s0 = inlined_call_operand.vmem [shape: bf16[16,144], index: 0, kind: input, shape index: {}]   ;;  %s268_s2 = inlined_call_operand.vmem [shape: f32[1,128], index: 2, kind: input, shape index: {}]   ;;  %s269_s3 = inlined_call_operand.vmem [shape: f32[16,128], index: 3, kind: output, shape index: {}]  }
   0x1   :  { %110 = vmatprep.subr.bf16.mxu0 %v203_v0  ;;  %v191_v1 = vld [vmem:[%s266_s1 + $0x38] sm:$0xff]   ;;  %v192_v2 = vld [vmem:[%s266_s1 + $0x30] sm:$0xff]   ;;  %v193_v3 = vld [vmem:[%s266_s1 + $0x28] sm:$0xff]  }
   0x2   :  { %111 = vmatpush1.bf16.msra.mxu0 %v191_v1  ;;  %v194_v4 = vld [vmem:[%s266_s1 + $0x20] sm:$0xff]   ;;  %v195_v6 = vld [vmem:[%s266_s1 + $0x18] sm:$0xff]   ;;  %v196_v7 = vld [vmem:[%s266_s1 + $0x10] sm:$0xff]  }
   0x3   :  { %112 = vmatprep.subr.bf16.mxu0 %v203_v0  ;;  %v202_v5 = vld [vmem:[%s267_s0 + $0x4] ss:$8 sps:$4 sm:$0xff]   ;;  %v200_v11 = vld [vmem:[%s267_s0] ss:$8 sps:$4 sm:$0xff]  }
   0x4   :  { %188 = vmatprep.mubr.msk.bf16.mxu0 %vm106_vm0, %v202_v5  ;;  %v197_v8 = vld [vmem:[%s266_s1 + $0x8] sm:$0xff]   ;;  %v198_v9 = vld [vmem:[%s266_s1] sm:$0xff]  }
   0x5   :  { %v199_v10 = vld [vmem:[%s266_s1 + $0x40] sm:$0xff]  }
   0x6   :  { %113 = vmatpush1.bf16.msra.mxu0 %v192_v2  ;;  %v189_v12 = vld [vmem:[%s268_s2] ss:$0 sm:$0xff] }
   0x7   :  { %114 = vmatprep.subr.bf16.mxu0 %v203_v0 }
   0xa   :  { %115 = vmatpush1.bf16.msra.mxu0 %v193_v3 }
   0xb   :  { %116 = vmatprep.subr.bf16.mxu0 %v203_v0 }
   0xe   :  { %117 = vmatpush1.bf16.msra.mxu0 %v194_v4 }
   0xf   :  { %118 = vmatprep.subr.bf16.mxu0 %v203_v0 }
  0x12   :  { %119 = vmatpush1.bf16.msra.mxu0 %v195_v6 }
  0x13   :  { %120 = vmatprep.subr.bf16.mxu0 %v203_v0 }
  0x16   :  { %121 = vmatpush1.bf16.msra.mxu0 %v196_v7 }
  0x17   :  { %122 = vmatprep.subr.bf16.mxu0 %v203_v0 }
  0x1a   :  { %123 = vmatpush1.bf16.msra.mxu0 %v197_v8 }
  0x1b   :  { %124 = vmatprep.subr.bf16.mxu0 %v203_v0 }
  0x1e   :  { %125 = vmatpush1.bf16.msra.mxu0 %v198_v9 }
  0x1f   :  { %140 = vmatprep.subr.bf16.mxu0 %v203_v0 }
  0x22   :  { %141 = vmatpush2.bf16.msra.mxu0 %v199_v10 }
  0x25   :  { %143 = vmatmul.mubr.bf16.vlgmr.msra.gmra.mxu0 %v200_v11 }
  0xe5   :  { %v144_v13 = vpop.f32.mrf.mxu0 }
  0xe6   :  { %v167_v14 = vadd.f32 %v189_v12, %v144_v13 }
  0xe7   :  { %v146_v15 = vpop.f32.mrf.mxu0 }
  0xe8   :  { %v169_v16 = vmax.f32 %v167_v14, 0.0 }
  0xe9   :  { %v147_v17 = vpop.f32.mrf.mxu0 }
  0xea   :  { %171 = vst [vmem:[%s269_s3] sm:$0xff] %v169_v16  ;;  %v168_v18 = vadd.f32 %v189_v12, %v147_v17 }
  0xeb   :  { %v149_v19 = vpop.f32.mrf.mxu0 }
  0xec   :  { %v170_v20 = vmax.f32 %v168_v18, 0.0 }
  0xee   :  { %172 = vst [vmem:[%s269_s3 + $0x8] sm:$0xff] %v170_v20 }

// kernel: mtfcn_forward.9
= control target key start
LH: loop header
LB: loop body
LE: loop exit
PB: predicated region body
PF: predicated region fallthrough
CT: control target
= control target key end

     0   :  { %v136_v0 = vmov 0.0   ;;  %vm137_vm0 = vmmov 0   ;;  %vm46_vm1 = vcmask 261120   ;;  %s176_s1 = inlined_call_operand.vmem [shape: bf16[32,128], index: 1, kind: input, shape index: {}]   ;;  %s177_s0 = inlined_call_operand.vmem [shape: bf16[16,32], index: 0, kind: input, shape index: {}]   ;;  %s178_s2 = inlined_call_operand.vmem [shape: f32[1,128], index: 2, kind: input, shape index: {}]   ;;  %s179_s3 = inlined_call_operand.vmem [shape: f32[16,128], index: 3, kind: output, shape index: {}]  }
   0x1   :  { %123 = vmatprep.subr.bf16.mxu0 %v136_v0  ;;  %v133_v1 = vld [vmem:[%s176_s1 + $0x8] sm:$0xff]   ;;  %127 = vmatprep.mubr.msk.bf16.mxu0 %vm137_vm0, %v136_v0  ;;  %v134_v2 = vld [vmem:[%s176_s1] sm:$0xff]  }
   0x2   :  { %124 = vmatpush3.bf16.msra.mxu0 %v133_v1  ;;  %v135_v3 = vld [vmem:[%s177_s0] sm:$0xff]  }
   0x3   :  { %125 = vmatprep.subr.bf16.mxu0 %v136_v0  ;;  %v119_v4 = vld [vmem:[%s178_s2] ss:$0 sm:$0xff] }
   0x6   :  { %126 = vmatpush3.bf16.msra.mxu0 %v134_v2 }
   0x9   :  { %128 = vmatmul.mubr.msk.bf16.vlgmr.msra.gmra.mxu0 %vm46_vm1, %v135_v3 }
  0xc9   :  { %v84_v5 = vpop.f32.mrf.mxu0 }
  0xca   :  { %v107_v6 = vadd.f32 %v119_v4, %v84_v5 }
  0xcb   :  { %v129_v7 = vpop.f32.mrf.mxu0 }
  0xcc   :  { %109 = vst [vmem:[%s179_s3] sm:$0xff] %v107_v6 }
  0xcd   :  { %v87_v8 = vpop.f32.mrf.mxu0 }
  0xce   :  { %v108_v9 = vadd.f32 %v119_v4, %v87_v8 }
  0xcf   :  { %v130_v10 = vpop.f32.mrf.mxu0 }
  0xd0   :  { %110 = vst [vmem:[%s179_s3 + $0x8] sm:$0xff] %v108_v9 }

</bundles_post_ra>
